<compile_context>
chip_gen: v7x
topology: tpu7x:2x2x1
jax: 0.10.0
libtpu: 0.0.40
codegen_flags: <defaults>
</compile_context>

<pallas_src>
import functools

import jax
import jax.numpy as jnp
from jax import lax
from jax.experimental import pallas as pl
from jax.experimental.pallas import tpu as pltpu

WEIGHT_START = 0.5  # deterministic "parameters" from __init__ defaults
WEIGHT_END = 0.5
_IGNORE_INDEX = -100  # nn.CrossEntropyLoss default ignore_index


def _round_up(x, m):
    return ((x + m - 1) // m) * m


def _start_end_loss_kernel(start_ref, end_ref, tgt_ref, out_ref, *, batch, tile_b):
    """Per batch-tile: partial CE sums + valid-row counts for both heads."""
    num_classes = start_ref.shape[-1]

    # One lane-vector iota shared by both heads (no full-tile int32 temporary).
    cls_ids = lax.broadcasted_iota(jnp.int32, (1, num_classes), 1)      # (1, S)

    # Ragged-tail masking done in-kernel: global row index per sublane.
    row0 = pl.program_id(0) * tile_b
    row_ids = row0 + lax.broadcasted_iota(jnp.int32, (tile_b, 1), 0)    # (tb, 1)
    row_ok = row_ids < batch                                            # (tb, 1)

    def head(x_raw, tgt):
        x = x_raw.astype(jnp.float32)                                   # (tb, S)
        # Row validity: in-range batch row AND a usable target
        # (ignore_index / out-of-range targets contribute nothing).
        valid = jnp.logical_and(row_ok,
                                jnp.logical_and(tgt >= 0, tgt < num_classes))
        # Pick the target logit with a masked compare-sum (fused before the exp
        # pass so at most one full-tile f32 temporary is live at a time).
        picked = jnp.sum(jnp.where(cls_ids == tgt, x, 0.0),
                         axis=-1, keepdims=True)                        # (tb, 1)
        m = jnp.max(x, axis=-1, keepdims=True)                          # (tb, 1)
        lse = m + jnp.log(jnp.sum(jnp.exp(x - m), axis=-1, keepdims=True))
        per_row = jnp.where(valid, lse - picked, 0.0)
        return jnp.sum(per_row), jnp.sum(valid.astype(jnp.float32))

    tgt_s = tgt_ref[:, 0:1]
    tgt_e = tgt_ref[:, 1:2]
    s_sum, s_cnt = head(start_ref[...], tgt_s)
    e_sum, e_cnt = head(end_ref[...], tgt_e)
    out_ref[0, 0] = s_sum
    out_ref[0, 1] = s_cnt
    out_ref[0, 2] = e_sum
    out_ref[0, 3] = e_cnt


def start_and_end_loss(start_logits, end_logits, truth_start, truth_end,
                       *, weight_start=WEIGHT_START, weight_end=WEIGHT_END):
    """start/end_logits: (B, S) float (f32 or bf16); truth_*: (B,) int class indices."""
    B, S = start_logits.shape
    itemsize = jnp.dtype(start_logits.dtype).itemsize
    # Sublane granularity for the packed input dtype (f32:8, bf16:16, 8-bit:32).
    sub = {4: 8, 2: 16, 1: 32}.get(itemsize, 8)

    # Adaptive batch tile: ~2 MiB of logits per head per step, >= 2 grid steps
    # when B allows (v7x megacore), rounded to the sublane granule.
    tile_b = _round_up(max(1, (2 << 20) // max(1, S * itemsize)), sub)
    tile_b = min(tile_b, max(sub, _round_up(-(-B // 2), sub)))
    tile_b = max(sub, min(tile_b, _round_up(B, sub)))
    num_tiles = pl.cdiv(B, tile_b)

    # Pack both target vectors into one (B, 2) int32 array (3 DMAs/step, not 4).
    tgt = jnp.stack([truth_start, truth_end], axis=1).astype(jnp.int32)

    # VMEM budget: 2 logits inputs x 2 pipeline buffers + ~4 full-tile f32
    # temporaries + slack. Clamp into a range safe on all generations
    # (v7x physical VMEM is 64 MiB; v5e default scoped limit is only 16 MiB).
    block_bytes = tile_b * S * itemsize
    f32_block = tile_b * S * 4
    vmem_needed = 2 * 2 * block_bytes + 4 * f32_block + (2 << 20)
    vmem_limit = int(min(max(vmem_needed, 32 << 20), 48 << 20))

    cost = pl.CostEstimate(
        flops=10 * B * S,
        transcendentals=2 * B * S + 2 * B,
        bytes_accessed=2 * B * S * itemsize + B * 2 * 4 + num_tiles * 16,
    )

    partials = pl.pallas_call(
        functools.partial(_start_end_loss_kernel, batch=B, tile_b=tile_b),
        out_shape=jax.ShapeDtypeStruct((num_tiles, 4), jnp.float32),
        grid=(num_tiles,),
        in_specs=[
            pl.BlockSpec((tile_b, S), lambda i: (i, 0)),   # start_logits tile
            pl.BlockSpec((tile_b, S), lambda i: (i, 0)),   # end_logits tile
            pl.BlockSpec((tile_b, 2), lambda i: (i, 0)),   # packed targets tile
        ],
        out_specs=pl.BlockSpec((1, 4), lambda i: (i, 0),
                               memory_space=pltpu.MemorySpace.SMEM),
        compiler_params=pltpu.CompilerParams(
            dimension_semantics=("parallel",),
            vmem_limit_bytes=vmem_limit),
        cost_estimate=cost,
    )(start_logits, end_logits, tgt)

    s_sum = jnp.sum(partials[:, 0])
    s_cnt = jnp.sum(partials[:, 1])
    e_sum = jnp.sum(partials[:, 2])
    e_cnt = jnp.sum(partials[:, 3])
    start_loss = s_sum / s_cnt   # mean over non-ignored rows (NaN if none, like torch)
    end_loss = e_sum / e_cnt
    return weight_start * start_loss + weight_end * end_loss


def _reference(start_logits, end_logits, truth_start, truth_end):
    """Pure-JAX reference matching torch CrossEntropyLoss (ignore_index=-100)."""
    def ce(logits, tgt):
        logp = jax.nn.log_softmax(logits.astype(jnp.float32), axis=-1)
        valid = tgt != _IGNORE_INDEX
        safe_t = jnp.where(valid, tgt, 0)
        nll = -jnp.take_along_axis(logp, safe_t[:, None], axis=-1)[:, 0]
        return jnp.sum(jnp.where(valid, nll, 0.0)) / jnp.sum(valid)
    return (WEIGHT_START * ce(start_logits, truth_start)
            + WEIGHT_END * ce(end_logits, truth_end))


if __name__ == "__main__":
    key = jax.random.PRNGKey(0)
    ks = jax.random.split(key, 12)

    # Case 1: f32, batch aligned to the sublane granule.
    B, S = 8, 128
    sl1 = jax.random.normal(ks[0], (B, S), dtype=jnp.float32)
    el1 = jax.random.normal(ks[1], (B, S), dtype=jnp.float32)
    ts1 = jax.random.randint(ks[2], (B,), 0, S, dtype=jnp.int32)
    te1 = jax.random.randint(ks[3], (B,), 0, S, dtype=jnp.int32)
    loss1 = jax.block_until_ready(start_and_end_loss(sl1, el1, ts1, te1))
    ref1 = _reference(sl1, el1, ts1, te1)
    assert jnp.allclose(loss1, ref1, rtol=1e-5, atol=1e-5), (loss1, ref1)

    # Case 2: bf16 logits, ragged batch (in-kernel tail masking) + an
    # ignore_index=-100 target.
    B2, S2 = 10, 256
    sl2 = jax.random.normal(ks[4], (B2, S2), dtype=jnp.bfloat16)
    el2 = jax.random.normal(ks[5], (B2, S2), dtype=jnp.bfloat16)
    ts2 = jax.random.randint(ks[6], (B2,), 0, S2, dtype=jnp.int32)
    te2 = jax.random.randint(ks[7], (B2,), 0, S2, dtype=jnp.int32)
    ts2 = ts2.at[3].set(_IGNORE_INDEX)
    loss2 = jax.block_until_ready(start_and_end_loss(sl2, el2, ts2, te2))
    ref2 = _reference(sl2, el2, ts2, te2)
    assert jnp.allclose(loss2, ref2, rtol=1e-4, atol=1e-4), (loss2, ref2)

    # Case 3: f32, S not a multiple of 128 and ragged batch across 2 grid tiles.
    B3, S3 = 9, 100
    sl3 = jax.random.normal(ks[8], (B3, S3), dtype=jnp.float32)
    el3 = jax.random.normal(ks[9], (B3, S3), dtype=jnp.float32)
    ts3 = jax.random.randint(ks[10], (B3,), 0, S3, dtype=jnp.int32)
    te3 = jax.random.randint(ks[11], (B3,), 0, S3, dtype=jnp.int32)
    loss3 = jax.block_until_ready(start_and_end_loss(sl3, el3, ts3, te3))
    ref3 = _reference(sl3, el3, ts3, te3)
    assert jnp.allclose(loss3, ref3, rtol=1e-5, atol=1e-5), (loss3, ref3)

    print("KERNEL_OK")
</pallas_src>

<mosaic_0001>
module attributes {stable_mosaic.version = 11 : i64} {
  func.func @_start_end_loss_kernel(%arg0: i32, %arg1: memref<8x128xf32, #tpu.memory_space<vmem>>, %arg2: memref<8x128xf32, #tpu.memory_space<vmem>>, %arg3: memref<8x2xi32, #tpu.memory_space<vmem>>, %arg4: memref<1x4xf32, #tpu.memory_space<smem>>) attributes {dimension_semantics = [#tpu.dimension_semantics<parallel>], iteration_bounds = array<i64: 1>, scalar_prefetch = 0 : i64, scratch_operands = 0 : i64, tpu.core_type = #tpu.core_type<tc>, window_params = [{transform_indices = @transform_0, window_bounds = array<i64: 8, 128>}, {transform_indices = @transform_1, window_bounds = array<i64: 8, 128>}, {transform_indices = @transform_2, window_bounds = array<i64: 8, 2>}, {transform_indices = @transform_3, window_bounds = array<i64: 1, 4>}]} {
    %0 = tpu.iota {dimensions = array<i32: 1>} : vector<1x128xi32>
    %c8_i32 = arith.constant 8 : i32
    %1 = arith.muli %arg0, %c8_i32 : i32
    %2 = tpu.iota {dimensions = array<i32: 0>} : vector<8x1xi32>
    %3 = vector.broadcast %1 : i32 to vector<8x1xi32>
    %4 = arith.addi %3, %2 : vector<8x1xi32>
    %c8_i32_0 = arith.constant 8 : i32
    %5 = vector.broadcast %c8_i32_0 : i32 to vector<8x1xi32>
    %6 = arith.cmpi slt, %4, %5 : vector<8x1xi32>
    %c0 = arith.constant 0 : index
    %c0_1 = arith.constant 0 : index
    %7 = vector.load %arg3[%c0, %c0_1] : memref<8x2xi32, #tpu.memory_space<vmem>>, vector<8x1xi32>
    %c0_2 = arith.constant 0 : index
    %c1 = arith.constant 1 : index
    %8 = vector.load %arg3[%c0_2, %c1] : memref<8x2xi32, #tpu.memory_space<vmem>>, vector<8x1xi32>
    %c0_3 = arith.constant 0 : index
    %c0_4 = arith.constant 0 : index
    %9 = vector.load %arg1[%c0_3, %c0_4] : memref<8x128xf32, #tpu.memory_space<vmem>>, vector<8x128xf32>
    %c0_i32 = arith.constant 0 : i32
    %10 = vector.broadcast %c0_i32 : i32 to vector<8x1xi32>
    %11 = arith.cmpi sge, %7, %10 : vector<8x1xi32>
    %c128_i32 = arith.constant 128 : i32
    %12 = vector.broadcast %c128_i32 : i32 to vector<8x1xi32>
    %13 = arith.cmpi slt, %7, %12 : vector<8x1xi32>
    %14 = arith.andi %11, %13 : vector<8x1xi1>
    %15 = arith.andi %6, %14 : vector<8x1xi1>
    %16 = vector.broadcast %0 : vector<1x128xi32> to vector<8x128xi32>
    %17 = vector.broadcast %7 : vector<8x1xi32> to vector<8x128xi32>
    %18 = arith.cmpi eq, %16, %17 : vector<8x128xi32>
    %cst = arith.constant 0.000000e+00 : f32
    %19 = vector.broadcast %cst : f32 to vector<8x128xf32>
    %20 = arith.select %18, %9, %19 : vector<8x128xi1>, vector<8x128xf32>
    %cst_5 = arith.constant dense<0.000000e+00> : vector<8xf32>
    %21 = vector.multi_reduction <add>, %20, %cst_5 [1] : vector<8x128xf32> to vector<8xf32>
    %22 = vector.shape_cast %21 : vector<8xf32> to vector<8x1xf32>
    %cst_6 = arith.constant dense<0xFF800000> : vector<8xf32>
    %23 = vector.multi_reduction <maximumf>, %9, %cst_6 [1] : vector<8x128xf32> to vector<8xf32>
    %24 = vector.shape_cast %23 : vector<8xf32> to vector<8x1xf32>
    %25 = vector.broadcast %24 : vector<8x1xf32> to vector<8x128xf32>
    %26 = arith.subf %9, %25 : vector<8x128xf32>
    %27 = math.exp %26 : vector<8x128xf32>
    %cst_7 = arith.constant dense<0.000000e+00> : vector<8xf32>
    %28 = vector.multi_reduction <add>, %27, %cst_7 [1] : vector<8x128xf32> to vector<8xf32>
    %29 = vector.shape_cast %28 : vector<8xf32> to vector<8x1xf32>
    %30 = math.log %29 : vector<8x1xf32>
    %31 = arith.addf %24, %30 : vector<8x1xf32>
    %32 = arith.subf %31, %22 : vector<8x1xf32>
    %cst_8 = arith.constant 0.000000e+00 : f32
    %33 = vector.broadcast %cst_8 : f32 to vector<8x1xf32>
    %34 = arith.select %15, %32, %33 : vector<8x1xi1>, vector<8x1xf32>
    %35 = vector.shape_cast %34 : vector<8x1xf32> to vector<1x8x1xf32>
    %cst_9 = arith.constant dense<0.000000e+00> : vector<1xf32>
    %36 = vector.multi_reduction <add>, %35, %cst_9 [1, 2] : vector<1x8x1xf32> to vector<1xf32>
    %37 = vector.shape_cast %36 : vector<1xf32> to vector<1x1x1xf32>
    %38 = vector.extract %37[0, 0, 0] : f32 from vector<1x1x1xf32>
    %39 = arith.extui %15 : vector<8x1xi1> to vector<8x1xi32>
    %40 = arith.sitofp %39 : vector<8x1xi32> to vector<8x1xf32>
    %41 = vector.shape_cast %40 : vector<8x1xf32> to vector<1x8x1xf32>
    %cst_10 = arith.constant dense<0.000000e+00> : vector<1xf32>
    %42 = vector.multi_reduction <add>, %41, %cst_10 [1, 2] : vector<1x8x1xf32> to vector<1xf32>
    %43 = vector.shape_cast %42 : vector<1xf32> to vector<1x1x1xf32>
    %44 = vector.extract %43[0, 0, 0] : f32 from vector<1x1x1xf32>
    %c0_11 = arith.constant 0 : index
    %c0_12 = arith.constant 0 : index
    %45 = vector.load %arg2[%c0_11, %c0_12] : memref<8x128xf32, #tpu.memory_space<vmem>>, vector<8x128xf32>
    %c0_i32_13 = arith.constant 0 : i32
    %46 = vector.broadcast %c0_i32_13 : i32 to vector<8x1xi32>
    %47 = arith.cmpi sge, %8, %46 : vector<8x1xi32>
    %c128_i32_14 = arith.constant 128 : i32
    %48 = vector.broadcast %c128_i32_14 : i32 to vector<8x1xi32>
    %49 = arith.cmpi slt, %8, %48 : vector<8x1xi32>
    %50 = arith.andi %47, %49 : vector<8x1xi1>
    %51 = arith.andi %6, %50 : vector<8x1xi1>
    %52 = vector.broadcast %0 : vector<1x128xi32> to vector<8x128xi32>
    %53 = vector.broadcast %8 : vector<8x1xi32> to vector<8x128xi32>
    %54 = arith.cmpi eq, %52, %53 : vector<8x128xi32>
    %cst_15 = arith.constant 0.000000e+00 : f32
    %55 = vector.broadcast %cst_15 : f32 to vector<8x128xf32>
    %56 = arith.select %54, %45, %55 : vector<8x128xi1>, vector<8x128xf32>
    %cst_16 = arith.constant dense<0.000000e+00> : vector<8xf32>
    %57 = vector.multi_reduction <add>, %56, %cst_16 [1] : vector<8x128xf32> to vector<8xf32>
    %58 = vector.shape_cast %57 : vector<8xf32> to vector<8x1xf32>
    %cst_17 = arith.constant dense<0xFF800000> : vector<8xf32>
    %59 = vector.multi_reduction <maximumf>, %45, %cst_17 [1] : vector<8x128xf32> to vector<8xf32>
    %60 = vector.shape_cast %59 : vector<8xf32> to vector<8x1xf32>
    %61 = vector.broadcast %60 : vector<8x1xf32> to vector<8x128xf32>
    %62 = arith.subf %45, %61 : vector<8x128xf32>
    %63 = math.exp %62 : vector<8x128xf32>
    %cst_18 = arith.constant dense<0.000000e+00> : vector<8xf32>
    %64 = vector.multi_reduction <add>, %63, %cst_18 [1] : vector<8x128xf32> to vector<8xf32>
    %65 = vector.shape_cast %64 : vector<8xf32> to vector<8x1xf32>
    %66 = math.log %65 : vector<8x1xf32>
    %67 = arith.addf %60, %66 : vector<8x1xf32>
    %68 = arith.subf %67, %58 : vector<8x1xf32>
    %cst_19 = arith.constant 0.000000e+00 : f32
    %69 = vector.broadcast %cst_19 : f32 to vector<8x1xf32>
    %70 = arith.select %51, %68, %69 : vector<8x1xi1>, vector<8x1xf32>
    %71 = vector.shape_cast %70 : vector<8x1xf32> to vector<1x8x1xf32>
    %cst_20 = arith.constant dense<0.000000e+00> : vector<1xf32>
    %72 = vector.multi_reduction <add>, %71, %cst_20 [1, 2] : vector<1x8x1xf32> to vector<1xf32>
    %73 = vector.shape_cast %72 : vector<1xf32> to vector<1x1x1xf32>
    %74 = vector.extract %73[0, 0, 0] : f32 from vector<1x1x1xf32>
    %75 = arith.extui %51 : vector<8x1xi1> to vector<8x1xi32>
    %76 = arith.sitofp %75 : vector<8x1xi32> to vector<8x1xf32>
    %77 = vector.shape_cast %76 : vector<8x1xf32> to vector<1x8x1xf32>
    %cst_21 = arith.constant dense<0.000000e+00> : vector<1xf32>
    %78 = vector.multi_reduction <add>, %77, %cst_21 [1, 2] : vector<1x8x1xf32> to vector<1xf32>
    %79 = vector.shape_cast %78 : vector<1xf32> to vector<1x1x1xf32>
    %80 = vector.extract %79[0, 0, 0] : f32 from vector<1x1x1xf32>
    %c0_22 = arith.constant 0 : index
    %c0_23 = arith.constant 0 : index
    %81 = memref.load %arg4[%c0_22, %c0_23] : memref<1x4xf32, #tpu.memory_space<smem>>
    memref.store %38, %arg4[%c0_22, %c0_23] : memref<1x4xf32, #tpu.memory_space<smem>>
    %c0_24 = arith.constant 0 : index
    %c1_25 = arith.constant 1 : index
    %82 = memref.load %arg4[%c0_24, %c1_25] : memref<1x4xf32, #tpu.memory_space<smem>>
    memref.store %44, %arg4[%c0_24, %c1_25] : memref<1x4xf32, #tpu.memory_space<smem>>
    %c0_26 = arith.constant 0 : index
    %c2 = arith.constant 2 : index
    %83 = memref.load %arg4[%c0_26, %c2] : memref<1x4xf32, #tpu.memory_space<smem>>
    memref.store %74, %arg4[%c0_26, %c2] : memref<1x4xf32, #tpu.memory_space<smem>>
    %c0_27 = arith.constant 0 : index
    %c3 = arith.constant 3 : index
    %84 = memref.load %arg4[%c0_27, %c3] : memref<1x4xf32, #tpu.memory_space<smem>>
    memref.store %80, %arg4[%c0_27, %c3] : memref<1x4xf32, #tpu.memory_space<smem>>
    return
  }
  func.func @transform_0(%arg0: i32) -> (i32, i32) {
    %c0_i32 = arith.constant 0 : i32
    %c0_i32_0 = arith.constant 0 : i32
    return %arg0, %c0_i32 : i32, i32
  }
  func.func @transform_1(%arg0: i32) -> (i32, i32) {
    %c0_i32 = arith.constant 0 : i32
    %c0_i32_0 = arith.constant 0 : i32
    return %arg0, %c0_i32 : i32, i32
  }
  func.func @transform_2(%arg0: i32) -> (i32, i32) {
    %c0_i32 = arith.constant 0 : i32
    %c0_i32_0 = arith.constant 0 : i32
    return %arg0, %c0_i32 : i32, i32
  }
  func.func @transform_3(%arg0: i32) -> (i32, i32) {
    %c0_i32 = arith.constant 0 : i32
    %c0_i32_0 = arith.constant 0 : i32
    return %arg0, %c0_i32 : i32, i32
  }
}

</mosaic_0001>

<bundles_post_ra>
// kernel: tpu_custom_call.1
= control target key start
LH: loop header
LB: loop body
LE: loop exit
PB: predicated region body
PF: predicated region fallthrough
CT: control target
= control target key end

     0   :  { %8 = vsyncpa [#allocation3], 0  ;;  %s284_s0 = inlined_call_operand.vmem [shape: f32[8,128], index: 0, kind: input, shape index: {}]   ;;  %s285_s1 = inlined_call_operand.hbm [shape: f32[8,128], index: 1, kind: input, shape index: {}]   ;;  %s286_s2 = inlined_call_operand.vmem [shape: s32[8,2], index: 2, kind: input, shape index: {}]   ;;  %s287_s3 = inlined_call_operand.hbm [shape: f32[1,4], index: 3, kind: output, shape index: {}]  }
   0x1   :  { %9 = vsyncpa [#allocation4], 0  ;;  %s214_s12 = smov [#allocation2]   ;;  %s178_s16 = scalar_lea.hbm %s285_s1, 128 }
   0x2   :  { %s18_s13 = sshll.u32 %s214_s12, 4  ;;  %p179_p0 = scmp.ne.s32.totalorder %s285_s1, %s178_s16  ;;  %s19_s13 = int_to_ptr.vmem [resolvable:$true] %s18_s13 }
   0x3   :  { %p182_p1 = scmp.lt.u32.totalorder %s178_s16, %s285_s1 }
   0x5   :  { %p184_p2 = pnand %p182_p1, %p179_p0 }
   0x7   :  { %187 = shalt.err (!%p184_p2)
}
   0x8   :  { %s188_s21 = scalar_lea.vmem %s19_s13, 128  ;;  %p193_p4 = scmp.lt.s32.totalorder %s19_s13, %s19_s13 }
   0x9   :  { %p189_p3 = scmp.ne.s32.totalorder %s19_s13, %s188_s21  ;;  %p194_p5 = scmp.lt.s32.totalorder %s188_s21, %s188_s21 }
   0xb   :  { %p195_p6 = por %p194_p5, %p193_p4 }
   0xd   :  { %p196_p7 = pnand %p195_p6, %p189_p3 }
   0xf   :  { %199 = shalt.err (!%p196_p7)
}
  0x10   :  { %21 = dma.hbm_to_vmem [thread:$0]  %s285_s1, 128, %s19_s13, [#allocation3]  }
  0x11   :  { %210 = dma.done.wait [#allocation3], 128  }
  0x12   :  { %211 = vsyncadd [#allocation3], 4294967168  ;;  %v215_v0 = vmov 1   ;;  %v83_v1 = vld [vmem:[#allocation2] sm:$0xff]  ;;  %v216_v4 = vmov 0   ;;  %v27_v13 = vlaneseq  ;;  %v217_v18 = vmov 0.0  }
  0x13   :  { %168 = vset.pattern.permute.xlu0 %v215_v0  ;;  %v36_v2 = vld [vmem:[%s284_s0] sm:$0xff]  ;;  %169 = vset.pattern.permute.xlu1 %v216_v4  ;;  %s218_s0 = smov 127   ;;  %vm60_vm5 = vcmask 7168   ;;  %s200_s5 = scalar_lea.hbm %s287_s3, 16 }
  0x14   :  { %91 = vmax.xlane.f32.xlu0 %v83_v1  ;;  %48 = vmax.xlane.f32.xlu1 %v36_v2  ;;  %v35_v3 = vld [vmem:[%s286_s2] sm:$0xff]  ;;  %v28_v14 = vand.u32 127, %v27_v13  ;;  %p201_p8 = scmp.ne.s32.totalorder %s287_s3, %s200_s5  ;;  %p204_p9 = scmp.lt.u32.totalorder %s200_s5, %s287_s3 }
  0x15   :  { %vm37_vm1 = vcmp.ge.s32.totalorder %v35_v3, 0  ;;  %vm38_vm2 = vcmp.lt.s32.totalorder %v35_v3, 128 }
  0x16   :  { %vm258_vm3 = vmand %vm37_vm1, %vm38_vm2  ;;  %p206_p10 = pnand %p204_p9, %p201_p8 }
  0x17   :  { %v153_v19 = vsel %vm258_vm3, 1.0, %v217_v18 }
  0x18   :  { %v73_v23 = vsel %vm60_vm5, %v153_v19, 0.0 }
  0x2a   :  { %85 = vperm.xlu0 %168, %v35_v3  }
  0xa1   :  { %v92_v5 = vpop.xlane.xlu0 %91  ;;  %v49_v6 = vpop.xlane.xlu1 %48 }
  0xa2   :  { %v93_v7 = vsub.f32 %v83_v1, %v92_v5  ;;  %v50_v8 = vsub.f32 %v36_v2, %v49_v6 }
  0xa4   :  { %v94_v9 = vmul.f32 1.442695, %v93_v7  ;;  %v51_v10 = vmul.f32 1.442695, %v50_v8 }
  0xa6   :  { %170 = vpow2.f32 %v94_v9 }
  0xa7   :  { %172 = vpow2.f32 %v51_v10 }
  0xa9   :  { %v86_v15 = vpop.permute.xlu0 %85 }
  0xaa   :  { %vm87_vm0 = vcmp.eq.s32.totalorder %v28_v14, %v86_v15 }
  0xab   :  { %v88_v16 = vsel %vm87_vm0, %v83_v1, 0.0 }
  0xb0   :  { %v171_v11 = vpop.eup %170 }
  0xb1   :  { %v173_v12 = vpop.eup %172  ;;  %96 = vadd.xlane.f32.xlu1 %v171_v11 }
  0xb2   :  { %53 = vadd.xlane.f32.xlu0 %v173_v12 }
  0xc2   :  { %42 = vperm.xlu1 %169, %v35_v3  }
  0xc8   :  { %118 = vrot.lane.b32.xlu0 %v153_v19, %s218_s0 }
  0xe6   :  { %89 = vadd.xlane.f32.xlu1 %v88_v16 }
  0xe7   :  { %74 = vadd.xlane.f32.xlu0 %v73_v23 }
 0x13e   :  { %v97_v20 = vpop.xlane.xlu1 %96 }
 0x13f   :  { %174 = vlog2.f32 %v97_v20  ;;  %v54_v30 = vpop.xlane.xlu0 %53 }
 0x140   :  { %176 = vlog2.f32 %v54_v30 }
 0x142   :  { %v43_v21 = vpop.permute.xlu1 %42 }
 0x143   :  { %vm44_vm4 = vcmp.eq.s32.totalorder %v28_v14, %v43_v21  ;;  %v119_v39 = vpop.permute.xlu0 %118 }
 0x144   :  { %v45_v22 = vsel %vm44_vm4, %v36_v2, 0.0  ;;  %v121_v41 = vsel %vm60_vm5, %v119_v39, 0.0 }
 0x145   :  { %46 = vadd.xlane.f32.xlu1 %v45_v22 }
 0x149   :  { %v175_v24 = vpop.eup %174 }
 0x14a   :  { %v99_v25 = vmul.f32 0.6931472, %v175_v24  ;;  %v177_v31 = vpop.eup %176 }
 0x14b   :  { %v56_v32 = vmul.f32 0.6931472, %v177_v31 }
 0x14c   :  { %v100_v26 = vadd.f32 %v99_v25, %v92_v5 }
 0x14d   :  { %v57_v33 = vadd.f32 %v56_v32, %v49_v6 }
 0x173   :  { %v90_v27 = vpop.xlane.xlu1 %89 }
 0x174   :  { %v101_v28 = vsub.f32 %v100_v26, %v90_v27  ;;  %v75_v42 = vpop.xlane.xlu0 %74 }
 0x175   :  { %v76_v43 = vrot.slane %v75_v42, 4 }
 0x176   :  { %v102_v29 = vsel %vm258_vm3, %v101_v28, 0.0 }
 0x177   :  { %104 = vrot.lane.b32.xlu1 %v102_v29, %s218_s0  ;;  %v77_v44 = vadd.f32 %v76_v43, %v75_v42 }
 0x179   :  { %v78_v45 = vrot.slane %v77_v44, 2 }
 0x17b   :  { %v79_v48 = vadd.f32 %v78_v45, %v77_v44 }
 0x17d   :  { %v80_v51 = vrot.slane %v79_v48, 1 }
 0x17f   :  { %v81_v54 = vadd.f32 %v80_v51, %v79_v48 }
 0x1d2   :  { %v47_v34 = vpop.xlane.xlu1 %46 }
 0x1d3   :  { %v58_v35 = vsub.f32 %v57_v33, %v47_v34 }
 0x1d5   :  { %v59_v36 = vsel %vm258_vm3, %v58_v35, 0.0 }
 0x1d6   :  { %v61_v37 = vsel %vm60_vm5, %v59_v36, 0.0 }
 0x1d7   :  { %62 = vadd.xlane.f32.xlu1 %v61_v37 }
 0x1e9   :  { %v105_v38 = vpop.permute.xlu1 %104 }
 0x1ea   :  { %v107_v40 = vsel %vm60_vm5, %v105_v38, 0.0 }
 0x1eb   :  { %108 = vadd.xlane.f32.xlu1 %v107_v40 }
 0x1ef   :  { %122 = vadd.xlane.f32.xlu1 %v121_v41 }
 0x264   :  { %v63_v46 = vpop.xlane.xlu1 %62 }
 0x265   :  { %v64_v47 = vrot.slane %v63_v46, 4 }
 0x267   :  { %v65_v49 = vadd.f32 %v64_v47, %v63_v46 }
 0x269   :  { %v66_v50 = vrot.slane %v65_v49, 2 }
 0x26b   :  { %v67_v52 = vadd.f32 %v66_v50, %v65_v49 }
 0x26d   :  { %v68_v53 = vrot.slane %v67_v52, 1 }
 0x26f   :  { %v69_v55 = vadd.f32 %v68_v53, %v67_v52 }
 0x271   :  { %154 = vpush %v69_v55 }
 0x272   :  { %156 = vpush %v81_v54 }
 0x278   :  { %v109_v56 = vpop.xlane.xlu1 %108 }
 0x279   :  { %v110_v57 = vrot.slane %v109_v56, 4 }
 0x27b   :  { %v111_v58 = vadd.f32 %v110_v57, %v109_v56 }
 0x27c   :  { %v123_v59 = vpop.xlane.xlu1 %122 }
 0x27d   :  { %v112_v60 = vrot.slane %v111_v58, 2  ;;  %v124_v61 = vrot.slane %v123_v59, 4 }
 0x27f   :  { %v125_v62 = vadd.f32 %v124_v61, %v123_v59  ;;  %v113_v63 = vadd.f32 %v112_v60, %v111_v58 }
 0x281   :  { %v126_v0 = vrot.slane %v125_v62, 2  ;;  %v114_v1 = vrot.slane %v113_v63, 1 }
 0x283   :  { %v127_v2 = vadd.f32 %v126_v0, %v125_v62  ;;  %v115_v3 = vadd.f32 %v114_v1, %v113_v63 }
 0x285   :  { %158 = vpush %v115_v3  ;;  %v128_v4 = vrot.slane %v127_v2, 1 }
 0x287   :  { %v129_v5 = vadd.f32 %v128_v4, %v127_v2 }
 0x289   :  { %160 = vpush %v129_v5 }
 0x2a2   :  { %s155_s1 = spop %154 }
 0x2a3   :  { %132 = sst [smem:[#allocation5]] %s155_s1  ;;  %s157_s2 = spop %156 }
 0x2a4   :  { %134 = sst [smem:[#allocation5 + $0x1]] %s157_s2 }
 0x2b6   :  { %s159_s28 = spop %158 }
 0x2b7   :  { %136 = sst [smem:[#allocation5 + $0x2]] %s159_s28 }
 0x2ba   :  { %s161_s29 = spop %160 }
 0x2bb   :  { %138 = sst [smem:[#allocation5 + $0x3]] %s161_s29 }
 0x2bc   :  { %209 = shalt.err (!%p206_p10)
}
 0x2bd   :  { %s219_s10 = smov [#allocation5]  }
 0x2be   :  { %146 = dma.smem_to_hbm %s219_s10, 16, %s287_s3, [#allocation4]  }
 0x2bf   :  { %212 = dma.done.wait [#allocation4], 16  }
 0x2c0   :  { %213 = vsyncadd [#allocation4], 4294967280 }
 0x2c1   :  { %150 = sfence }
 0x2c2   :  { %151 = vsyncpa [#allocation3], 1 }
 0x2c3   :  { %152 = vsyncpa [#allocation4], 1 }

</bundles_post_ra>
